<compile_context>
chip_gen: v6e
topology: v6e:2x2x1
jax: 0.10.0
libtpu: 0.0.40
codegen_flags: <defaults>
</compile_context>

<pallas_src>
import math

import jax
import jax.numpy as jnp
from jax.experimental import pallas as pl
from jax.experimental.pallas import tpu as pltpu

# ---------------- configuration (small synthetic sizes) ----------------
B = 2                      # batch
IMG = 16                   # input spatial resolution
NV = 128                   # number of voxels (lane-aligned)
LAYERS_2D = ("conv1", "conv2")
LAYERS_1D = ("fc",)
CHANNELS_2D = {"conv1": tuple(range(0, 16, 2)),    # 8 of 16 channels (stride-2 slice)
               "conv2": tuple(range(1, 16, 2))}    # 8 of 16 channels (stride-2 slice)
CHANNELS_1D = {"fc": tuple(range(16))}             # 16 of 32 fc units
RES = ((IMG, IMG), (IMG // 2, IMG // 2))
RES_ID = {"conv1": 0, "conv2": 1}

C1 = len(CHANNELS_2D["conv1"])                     # 8
C2 = len(CHANNELS_2D["conv2"])                     # 8
N_2D = C1 + C2                                     # 16
N_1D = sum(len(v) for v in CHANNELS_1D.values())   # 16 (== N_2D, required by the + in forward)
L1 = RES[0][0] * RES[0][1]                         # 256
L2 = RES[1][0] * RES[1][1]                         # 64


# ---------------- Pallas kernel: the encoder_terms hot path ----------------
def encoder_terms_kernel(feat1_ref, rf1_ref, feat2_ref, rf2_ref,
                         w2d_ref, f1d_ref, w1d_ref, out_ref):
    b, n, nvt = out_ref.shape
    c1 = feat1_ref.shape[0] // b
    c2 = feat2_ref.shape[0] // b

    # Batch folded into M: [B*C1, L1] @ [L1, nvt] and [B*C2, L2] @ [L2, nvt]
    # on the MXU (bf16 operands, f32 accumulation).
    s1 = jnp.dot(feat1_ref[...], rf1_ref[...],
                 preferred_element_type=jnp.float32)          # [B*C1, nvt] f32
    s2 = jnp.dot(feat2_ref[...], rf2_ref[...],
                 preferred_element_type=jnp.float32)          # [B*C2, nvt] f32

    w2d = w2d_ref[...]                                        # [N, nvt] f32
    w1d = w1d_ref[...]                                        # [N, nvt] f32
    f1d = f1d_ref[...]                                        # [B, N]   f32

    # Store each layer's half directly (no in-kernel concatenate); both halves
    # are sublane-aligned (c1 % 8 == 0). The sigma_1d term is fused per-half,
    # so no [B, N, nvt] temporary is materialized.
    out_ref[:, :c1, :] = (
        s1.reshape(b, c1, nvt) * w2d[:c1, :]
        + f1d[:, :c1, None] * w1d[:c1, :]).astype(out_ref.dtype)
    out_ref[:, c1:, :] = (
        s2.reshape(b, c2, nvt) * w2d[c1:, :]
        + f1d[:, c1:, None] * w1d[c1:, :]).astype(out_ref.dtype)


def encoder_terms_pallas(feat1, rf1, feat2, rf2, w2d, f1d, w1d, *, nv_tile=None):
    bc1, l1 = feat1.shape
    bc2, l2 = feat2.shape
    b, n1d = f1d.shape
    n, nv = w2d.shape
    c1, c2 = bc1 // b, bc2 // b
    # The final sigma_2d + sigma_1d add requires N_1d == N_2d; fail loudly.
    assert c1 + c2 == n, (c1, c2, n)
    assert n1d == n, (n1d, n)
    assert rf1.shape == (l1, nv) and rf2.shape == (l2, nv) and w1d.shape == (n, nv)
    # Split stores need sublane-aligned halves (8-row vreg sublane granularity).
    assert c1 % 8 == 0 and c2 % 8 == 0, (c1, c2)

    if nv_tile is None:
        # Full NV at these sizes; multiples of 256 at scale (v6e/v7x MXU width).
        nv_tile = nv if nv <= 512 else 512
    assert nv % nv_tile == 0 and nv_tile % 128 == 0, (nv, nv_tile)

    grid_spec = pltpu.PrefetchScalarGridSpec(
        num_scalar_prefetch=0,
        grid=(nv // nv_tile,),                                 # 1 step at NV=128
        in_specs=[
            pl.BlockSpec((bc1, l1), lambda j: (0, 0)),         # feat1 [B*C1, L1] (bf16)
            pl.BlockSpec((l1, nv_tile), lambda j: (0, j)),     # rf1   [L1, nv]   (bf16)
            pl.BlockSpec((bc2, l2), lambda j: (0, 0)),         # feat2 [B*C2, L2] (bf16)
            pl.BlockSpec((l2, nv_tile), lambda j: (0, j)),     # rf2   [L2, nv]   (bf16)
            pl.BlockSpec((n, nv_tile), lambda j: (0, j)),      # w_2d  [N, nv]    (f32)
            pl.BlockSpec((b, n), lambda j: (0, 0)),            # 1d feats [B, N]  (f32)
            pl.BlockSpec((n, nv_tile), lambda j: (0, j)),      # w_1d  [N, nv]    (f32)
        ],
        out_specs=pl.BlockSpec((b, n, nv_tile), lambda j: (0, 0, j)),
    )
    return pl.pallas_call(
        encoder_terms_kernel,
        out_shape=jax.ShapeDtypeStruct((b, n, nv), jnp.float32),
        grid_spec=grid_spec,
        compiler_params=pltpu.CompilerParams(dimension_semantics=("parallel",)),
    )(feat1, rf1, feat2, rf2, w2d, f1d, w1d)


# ---------------- deterministic parameter init ----------------
def _kaiming_uniform(key, shape, fan_in):
    # matches torch.nn.init.kaiming_uniform_(a=sqrt(5)): bound = 1/sqrt(fan_in)
    bound = 1.0 / math.sqrt(fan_in)
    return jax.random.uniform(key, shape, jnp.float32, -bound, bound)


def init_params(key):
    ks = jax.random.split(key, 8)
    return {
        # synthetic backbone (the external `model` passed to encoder_terms)
        "conv1_w": _kaiming_uniform(ks[0], (16, 3, 3, 3), 3 * 9),
        "conv2_w": _kaiming_uniform(ks[1], (16, 16, 3, 3), 16 * 9),
        "fc_w": _kaiming_uniform(ks[2], (16, 32), 16),
        "fc_b": jax.random.uniform(ks[3], (32,), jnp.float32, -0.1, 0.1),
        # encoder_terms parameters (shapes from __init__)
        "rfs": [
            _kaiming_uniform(ks[4], RES[0] + (NV,), RES[0][1] * NV),
            _kaiming_uniform(ks[5], RES[1] + (NV,), RES[1][1] * NV),
        ],
        "w_2d": _kaiming_uniform(ks[6], (N_2D, NV), NV),
        "w_1d": _kaiming_uniform(ks[7], (N_1D, NV), NV),
        # NOTE: self.b exists in the module but is unused by encoder_terms.forward
    }


# ---------------- synthetic backbone (plain-JAX glue; it is `self.model`) ----------------
def backbone(params, x):
    # x: [B, 3, IMG, IMG] NCHW (same convention as PyTorch)
    dn = ("NCHW", "OIHW", "NCHW")
    h1 = jax.nn.relu(jax.lax.conv_general_dilated(
        x, params["conv1_w"], (1, 1), "SAME", dimension_numbers=dn))      # [B,16,16,16]
    h2 = jax.nn.relu(jax.lax.conv_general_dilated(
        h1, params["conv2_w"], (2, 2), "SAME", dimension_numbers=dn))     # [B,16,8,8]
    fc = jax.nn.relu(h2.mean(axis=(2, 3)) @ params["fc_w"] + params["fc_b"])  # [B,32]
    return {"conv1": h1, "conv2": h2, "fc": fc}


# ---------------- encoder_terms forward (glue + Pallas kernel) ----------------
def encoder_terms_forward(params, x):
    feats = backbone(params, x)
    b = x.shape[0]
    # Static strided channel selection (CHANNELS_2D are 0::2 / 1::2) -> fuses
    # with the backbone relu; then fold batch into the matmul M dimension.
    feat1 = feats["conv1"][:, 0::2].reshape(b * C1, L1).astype(jnp.bfloat16)
    feat2 = feats["conv2"][:, 1::2].reshape(b * C2, L2).astype(jnp.bfloat16)
    rf1 = params["rfs"][RES_ID["conv1"]].reshape(L1, NV).astype(jnp.bfloat16)
    rf2 = params["rfs"][RES_ID["conv2"]].reshape(L2, NV).astype(jnp.bfloat16)
    # 1d features (fc channels 0..N_1D-1), kept in f32 for the epilogue.
    f1d = feats["fc"][:, :N_1D]                                            # [B, N_1d]
    return encoder_terms_pallas(
        feat1, rf1, feat2, rf2, params["w_2d"], f1d, params["w_1d"])


# ---------------- pure-JAX reference for validation (f32, HIGHEST) ----------------
def encoder_terms_reference(params, x):
    feats = backbone(params, x)
    hp = jax.lax.Precision.HIGHEST
    sigma_2d = jnp.concatenate([
        jnp.einsum(
            "bcl,lv->bcv",
            jnp.take(feats[k], jnp.array(CHANNELS_2D[k]), axis=1)
              .reshape(x.shape[0], len(CHANNELS_2D[k]), -1),
            params["rfs"][RES_ID[k]].reshape(-1, NV),
            precision=hp)
        for k in LAYERS_2D], axis=1)
    sigma_2d = sigma_2d * params["w_2d"][None]
    f1d = jnp.concatenate(
        [jnp.take(feats[k], jnp.array(CHANNELS_1D[k]), axis=1) for k in LAYERS_1D],
        axis=1)
    sigma_1d = f1d[:, :, None] * params["w_1d"][None]
    return sigma_2d + sigma_1d


if __name__ == "__main__":
    key = jax.random.PRNGKey(0)
    pk, xk = jax.random.split(key)
    params = init_params(pk)
    x = jax.random.normal(xk, (B, 3, IMG, IMG), jnp.float32)

    out = jax.block_until_ready(encoder_terms_forward(params, x))
    ref = jax.block_until_ready(encoder_terms_reference(params, x))

    assert out.shape == (B, N_2D, NV), out.shape
    # Tolerance is relaxed vs. the f32/HIGHEST reference because the matmul
    # operands are cast to bf16 (~2^-8 relative rounding per operand over
    # K<=256 accumulations); the sigma_1d/epilogue path stays exact f32.
    assert jnp.allclose(out, ref, rtol=2e-2, atol=2e-3), \
        float(jnp.max(jnp.abs(out - ref)))
    print("KERNEL_OK")
</pallas_src>

<mosaic_0001>
module attributes {stable_mosaic.version = 11 : i64} {
  func.func @encoder_terms_kernel(%arg0: i32, %arg1: memref<16x256xbf16, #tpu.memory_space<vmem>>, %arg2: memref<256x128xbf16, #tpu.memory_space<vmem>>, %arg3: memref<16x64xbf16, #tpu.memory_space<vmem>>, %arg4: memref<64x128xbf16, #tpu.memory_space<vmem>>, %arg5: memref<16x128xf32, #tpu.memory_space<vmem>>, %arg6: memref<2x16xf32, #tpu.memory_space<vmem>>, %arg7: memref<16x128xf32, #tpu.memory_space<vmem>>, %arg8: memref<2x16x128xf32, #tpu.memory_space<vmem>>) attributes {dimension_semantics = [#tpu.dimension_semantics<parallel>], iteration_bounds = array<i64: 1>, scalar_prefetch = 0 : i64, scratch_operands = 0 : i64, tpu.core_type = #tpu.core_type<tc>, window_params = [{pipeline_mode = #tpu.pipeline_mode<synchronous>, transform_indices = @transform_0, window_bounds = array<i64: 16, 256>}, {transform_indices = @transform_1, window_bounds = array<i64: 256, 128>}, {pipeline_mode = #tpu.pipeline_mode<synchronous>, transform_indices = @transform_2, window_bounds = array<i64: 16, 64>}, {transform_indices = @transform_3, window_bounds = array<i64: 64, 128>}, {transform_indices = @transform_4, window_bounds = array<i64: 16, 128>}, {pipeline_mode = #tpu.pipeline_mode<synchronous>, transform_indices = @transform_5, window_bounds = array<i64: 2, 16>}, {transform_indices = @transform_6, window_bounds = array<i64: 16, 128>}, {transform_indices = @transform_7, window_bounds = array<i64: 2, 16, 128>}]} {
    %c0 = arith.constant 0 : index
    %c0_0 = arith.constant 0 : index
    %0 = vector.load %arg1[%c0, %c0_0] : memref<16x256xbf16, #tpu.memory_space<vmem>>, vector<16x256xbf16>
    %c0_1 = arith.constant 0 : index
    %c0_2 = arith.constant 0 : index
    %1 = vector.load %arg2[%c0_1, %c0_2] : memref<256x128xbf16, #tpu.memory_space<vmem>>, vector<256x128xbf16>
    %cst = arith.constant dense<0.000000e+00> : vector<16x128xf32>
    %2 = tpu.matmul %0, %1, %cst {dimension_numbers = #tpu.dot_dimension_numbers<[1], [0], [0], [1], [0, 0, 1, 1], [], []>} : vector<16x256xbf16>, vector<256x128xbf16>, vector<16x128xf32> -> vector<16x128xf32>
    %c0_3 = arith.constant 0 : index
    %c0_4 = arith.constant 0 : index
    %3 = vector.load %arg3[%c0_3, %c0_4] : memref<16x64xbf16, #tpu.memory_space<vmem>>, vector<16x64xbf16>
    %c0_5 = arith.constant 0 : index
    %c0_6 = arith.constant 0 : index
    %4 = vector.load %arg4[%c0_5, %c0_6] : memref<64x128xbf16, #tpu.memory_space<vmem>>, vector<64x128xbf16>
    %cst_7 = arith.constant dense<0.000000e+00> : vector<16x128xf32>
    %5 = tpu.matmul %3, %4, %cst_7 {dimension_numbers = #tpu.dot_dimension_numbers<[1], [0], [0], [1], [0, 0, 1, 1], [], []>} : vector<16x64xbf16>, vector<64x128xbf16>, vector<16x128xf32> -> vector<16x128xf32>
    %c0_8 = arith.constant 0 : index
    %c0_9 = arith.constant 0 : index
    %6 = vector.load %arg5[%c0_8, %c0_9] : memref<16x128xf32, #tpu.memory_space<vmem>>, vector<16x128xf32>
    %c0_10 = arith.constant 0 : index
    %c0_11 = arith.constant 0 : index
    %7 = vector.load %arg7[%c0_10, %c0_11] : memref<16x128xf32, #tpu.memory_space<vmem>>, vector<16x128xf32>
    %c0_12 = arith.constant 0 : index
    %c0_13 = arith.constant 0 : index
    %8 = vector.load %arg6[%c0_12, %c0_13] : memref<2x16xf32, #tpu.memory_space<vmem>>, vector<2x16xf32>
    %9 = vector.shape_cast %2 : vector<16x128xf32> to vector<2x8x128xf32>
    %10 = vector.extract_strided_slice %6 {offsets = [0, 0], sizes = [8, 128], strides = [1, 1]} : vector<16x128xf32> to vector<8x128xf32>
    %11 = vector.shape_cast %10 : vector<8x128xf32> to vector<1x8x128xf32>
    %12 = vector.broadcast %11 : vector<1x8x128xf32> to vector<2x8x128xf32>
    %13 = arith.mulf %9, %12 : vector<2x8x128xf32>
    %14 = vector.extract_strided_slice %8 {offsets = [0, 0], sizes = [2, 8], strides = [1, 1]} : vector<2x16xf32> to vector<2x8xf32>
    %15 = vector.shape_cast %14 : vector<2x8xf32> to vector<2x8x1xf32>
    %16 = vector.extract_strided_slice %7 {offsets = [0, 0], sizes = [8, 128], strides = [1, 1]} : vector<16x128xf32> to vector<8x128xf32>
    %17 = vector.shape_cast %16 : vector<8x128xf32> to vector<1x8x128xf32>
    %18 = vector.broadcast %15 : vector<2x8x1xf32> to vector<2x8x128xf32>
    %19 = vector.broadcast %17 : vector<1x8x128xf32> to vector<2x8x128xf32>
    %20 = arith.mulf %18, %19 : vector<2x8x128xf32>
    %21 = arith.addf %13, %20 : vector<2x8x128xf32>
    %c0_14 = arith.constant 0 : index
    %c0_15 = arith.constant 0 : index
    %c0_16 = arith.constant 0 : index
    %22 = vector.load %arg8[%c0_14, %c0_15, %c0_16] : memref<2x16x128xf32, #tpu.memory_space<vmem>>, vector<2x8x128xf32>
    tpu.vector_store %arg8[%c0_14, %c0_15, %c0_16], %21 {strides = array<i32>} : memref<2x16x128xf32, #tpu.memory_space<vmem>>, vector<2x8x128xf32>,
    %23 = vector.shape_cast %5 : vector<16x128xf32> to vector<2x8x128xf32>
    %24 = vector.extract_strided_slice %6 {offsets = [8, 0], sizes = [8, 128], strides = [1, 1]} : vector<16x128xf32> to vector<8x128xf32>
    %25 = vector.shape_cast %24 : vector<8x128xf32> to vector<1x8x128xf32>
    %26 = vector.broadcast %25 : vector<1x8x128xf32> to vector<2x8x128xf32>
    %27 = arith.mulf %23, %26 : vector<2x8x128xf32>
    %28 = vector.extract_strided_slice %8 {offsets = [0, 8], sizes = [2, 8], strides = [1, 1]} : vector<2x16xf32> to vector<2x8xf32>
    %29 = vector.shape_cast %28 : vector<2x8xf32> to vector<2x8x1xf32>
    %30 = vector.extract_strided_slice %7 {offsets = [8, 0], sizes = [8, 128], strides = [1, 1]} : vector<16x128xf32> to vector<8x128xf32>
    %31 = vector.shape_cast %30 : vector<8x128xf32> to vector<1x8x128xf32>
    %32 = vector.broadcast %29 : vector<2x8x1xf32> to vector<2x8x128xf32>
    %33 = vector.broadcast %31 : vector<1x8x128xf32> to vector<2x8x128xf32>
    %34 = arith.mulf %32, %33 : vector<2x8x128xf32>
    %35 = arith.addf %27, %34 : vector<2x8x128xf32>
    %c0_17 = arith.constant 0 : index
    %c8 = arith.constant 8 : index
    %c0_18 = arith.constant 0 : index
    %36 = vector.load %arg8[%c0_17, %c8, %c0_18] : memref<2x16x128xf32, #tpu.memory_space<vmem>>, vector<2x8x128xf32>
    tpu.vector_store %arg8[%c0_17, %c8, %c0_18], %35 {strides = array<i32>} : memref<2x16x128xf32, #tpu.memory_space<vmem>>, vector<2x8x128xf32>,
    return
  }
  func.func @transform_0(%arg0: i32) -> (i32, i32) {
    %c0_i32 = arith.constant 0 : i32
    %c0_i32_0 = arith.constant 0 : i32
    %c0_i32_1 = arith.constant 0 : i32
    return %c0_i32, %c0_i32_0 : i32, i32
  }
  func.func @transform_1(%arg0: i32) -> (i32, i32) {
    %c0_i32 = arith.constant 0 : i32
    %c0_i32_0 = arith.constant 0 : i32
    return %c0_i32, %arg0 : i32, i32
  }
  func.func @transform_2(%arg0: i32) -> (i32, i32) {
    %c0_i32 = arith.constant 0 : i32
    %c0_i32_0 = arith.constant 0 : i32
    %c0_i32_1 = arith.constant 0 : i32
    return %c0_i32, %c0_i32_0 : i32, i32
  }
  func.func @transform_3(%arg0: i32) -> (i32, i32) {
    %c0_i32 = arith.constant 0 : i32
    %c0_i32_0 = arith.constant 0 : i32
    return %c0_i32, %arg0 : i32, i32
  }
  func.func @transform_4(%arg0: i32) -> (i32, i32) {
    %c0_i32 = arith.constant 0 : i32
    %c0_i32_0 = arith.constant 0 : i32
    return %c0_i32, %arg0 : i32, i32
  }
  func.func @transform_5(%arg0: i32) -> (i32, i32) {
    %c0_i32 = arith.constant 0 : i32
    %c0_i32_0 = arith.constant 0 : i32
    %c0_i32_1 = arith.constant 0 : i32
    return %c0_i32, %c0_i32_0 : i32, i32
  }
  func.func @transform_6(%arg0: i32) -> (i32, i32) {
    %c0_i32 = arith.constant 0 : i32
    %c0_i32_0 = arith.constant 0 : i32
    return %c0_i32, %arg0 : i32, i32
  }
  func.func @transform_7(%arg0: i32) -> (i32, i32, i32) {
    %c0_i32 = arith.constant 0 : i32
    %c0_i32_0 = arith.constant 0 : i32
    %c0_i32_1 = arith.constant 0 : i32
    return %c0_i32, %c0_i32_0, %arg0 : i32, i32, i32
  }
}

</mosaic_0001>

<bundles_post_ra>
// kernel: tpu_custom_call.1
= control target key start
LH: loop header
LB: loop body
LE: loop exit
PB: predicated region body
PF: predicated region fallthrough
CT: control target
= control target key end

     0   :  { %12 = vsyncpa [#allocation3], 0  ;;  %s786_s0 = inlined_call_operand.hbm [shape: bf16[16,256], index: 0, kind: input, shape index: {}]   ;;  %s787_s1 = inlined_call_operand.hbm [shape: bf16[256,128], index: 1, kind: input, shape index: {}]   ;;  %s788_s2 = inlined_call_operand.hbm [shape: bf16[16,64], index: 2, kind: input, shape index: {}]   ;;  %s789_s3 = inlined_call_operand.hbm [shape: bf16[64,128], index: 3, kind: input, shape index: {}]   ;;  %s790_s4 = inlined_call_operand.hbm [shape: f32[16,128], index: 4, kind: input, shape index: {}]   ;;  %s791_s5 = inlined_call_operand.vmem [shape: f32[2,16], index: 5, kind: input, shape index: {}]   ;;  %s792_s6 = inlined_call_operand.hbm [shape: f32[16,128], index: 6, kind: input, shape index: {}]   ;;  %s793_s7 = inlined_call_operand.hbm [shape: f32[2,16,128], index: 7, kind: output, shape index: {}]  }
   0x1   :  { %13 = vsyncpa [#allocation6], 0 }
   0x2   :  { %14 = vsyncpa [#allocation9], 0 }
   0x3   :  { %15 = vsyncpa [#allocation12], 0 }
   0x4   :  { %16 = vsyncpa [#allocation4], 0  ;;  %s688_s24 = smov [#allocation5]  }
   0x5   :  { %s34_s25 = sshll.u32 %s688_s24, 4  ;;  %s35_s25 = int_to_ptr.vmem [resolvable:$true] %s34_s25 }
   0x6   :  { %s546_s26 = scalar_lea.vmem %s35_s25, 2048  ;;  %p551_p1 = scmp.lt.s32.totalorder %s35_s25, %s35_s25 }
   0x7   :  { %p547_p0 = scmp.ne.s32.totalorder %s35_s25, %s546_s26  ;;  %p552_p2 = scmp.lt.s32.totalorder %s546_s26, %s546_s26 }
   0x9   :  { %p553_p3 = por %p552_p2, %p551_p1 }
   0xb   :  { %p554_p4 = pnand %p553_p3, %p547_p0 }
   0xd   :  { %557 = shalt.err (!%p554_p4)
}
   0xe   :  { %s689_s27 = smov 64   ;;  %s690_s28 = smov 4  }
   0xf   :  { %40 = dma.hbm_to_vmem [thread:$0]  %s787_s1, 2048, %s35_s25, [#allocation6], %s689_s27, %s689_s27, %s690_s28  }
  0x10   :  { %s691_s8 = smov [#allocation8]   ;;  %s692_s10 = smov [#allocation2]  }
  0x11   :  { %s58_s9 = sshll.u32 %s691_s8, 4  ;;  %s22_s11 = sshll.u32 %s692_s10, 4  ;;  %s59_s9 = int_to_ptr.vmem [resolvable:$true] %s58_s9  ;;  %s23_s11 = int_to_ptr.vmem [resolvable:$true] %s22_s11 }
  0x12   :  { %s566_s12 = scalar_lea.vmem %s59_s9, 512  ;;  %p571_p6 = scmp.lt.s32.totalorder %s59_s9, %s59_s9 }
  0x13   :  { %p567_p5 = scmp.ne.s32.totalorder %s59_s9, %s566_s12  ;;  %p572_p7 = scmp.lt.s32.totalorder %s566_s12, %s566_s12 }
  0x15   :  { %p573_p8 = por %p572_p7, %p571_p6 }
  0x17   :  { %p574_p9 = pnand %p573_p8, %p567_p5 }
  0x19   :  { %577 = shalt.err (!%p574_p9)
}
  0x1a   :  { %64 = dma.hbm_to_vmem [thread:$0]  %s789_s3, 512, %s59_s9, [#allocation9], %s689_s27, %s689_s27, %s690_s28  }
  0x1b   :  { %s586_s1 = scalar_lea.vmem %s23_s11, 256  ;;  %p591_p11 = scmp.lt.s32.totalorder %s23_s11, %s23_s11 }
  0x1c   :  { %p587_p10 = scmp.ne.s32.totalorder %s23_s11, %s586_s1  ;;  %p592_p12 = scmp.lt.s32.totalorder %s586_s1, %s586_s1 }
  0x1e   :  { %p593_p13 = por %p592_p12, %p591_p11 }
  0x20   :  { %p594_p0 = pnand %p593_p13, %p587_p10 }
  0x22   :  { %597 = shalt.err (!%p594_p0)
}
  0x23   :  { %s693_s15 = smov 128   ;;  %s694_s16 = smov 8  }
  0x24   :  { %28 = dma.hbm_to_vmem [thread:$0]  %s786_s0, 256, %s23_s11, [#allocation3], %s693_s15, %s693_s15, %s694_s16  }
  0x25   :  { %s695_s19 = smov [#allocation7]   ;;  %s696_s3 = smov [#allocation10]  }
  0x26   :  { %s46_s20 = sshll.u32 %s695_s19, 4  ;;  %s70_s21 = sshll.u32 %s696_s3, 4  ;;  %s47_s20 = int_to_ptr.vmem [resolvable:$true] %s46_s20  ;;  %s71_s21 = int_to_ptr.vmem [resolvable:$true] %s70_s21 }
  0x27   :  { %s606_s22 = scalar_lea.vmem %s47_s20, 128  ;;  %p611_p2 = scmp.lt.s32.totalorder %s47_s20, %s47_s20 }
  0x28   :  { %p607_p1 = scmp.ne.s32.totalorder %s47_s20, %s606_s22  ;;  %p612_p3 = scmp.lt.s32.totalorder %s606_s22, %s606_s22 }
  0x2a   :  { %p613_p4 = por %p612_p3, %p611_p2 }
  0x2c   :  { %p614_p5 = pnand %p613_p4, %p607_p1 }
  0x2e   :  { %617 = shalt.err (!%p614_p5)
}
  0x2f   :  { %52 = dma.hbm_to_vmem [thread:$0]  %s788_s2, 128, %s47_s20, [#allocation6], %s689_s27, %s689_s27, %s690_s28  }
  0x30   :  { %s626_s0 = scalar_lea.vmem %s71_s21, 256  ;;  %p631_p7 = scmp.lt.s32.totalorder %s71_s21, %s71_s21 }
  0x31   :  { %p627_p6 = scmp.ne.s32.totalorder %s71_s21, %s626_s0  ;;  %p632_p8 = scmp.lt.s32.totalorder %s626_s0, %s626_s0 }
  0x33   :  { %p633_p9 = por %p632_p8, %p631_p7 }
  0x35   :  { %p634_p10 = pnand %p633_p9, %p627_p6 }
  0x37   :  { %637 = shalt.err (!%p634_p10)
}
  0x38   :  { %76 = dma.hbm_to_vmem [thread:$0]  %s790_s4, 256, %s71_s21, [#allocation9], %s693_s15, %s693_s15, %s694_s16  }
  0x39   :  { %s697_s29 = smov [#allocation11]  }
  0x3a   :  { %s84_s30 = sshll.u32 %s697_s29, 4  ;;  %s85_s30 = int_to_ptr.vmem [resolvable:$true] %s84_s30 }
  0x3b   :  { %s646_s8 = scalar_lea.vmem %s85_s30, 256  ;;  %p651_p12 = scmp.lt.s32.totalorder %s85_s30, %s85_s30 }
  0x3c   :  { %p647_p11 = scmp.ne.s32.totalorder %s85_s30, %s646_s8  ;;  %p652_p13 = scmp.lt.s32.totalorder %s646_s8, %s646_s8 }
  0x3e   :  { %p653_p0 = por %p652_p13, %p651_p12 }
  0x40   :  { %p654_p1 = pnand %p653_p0, %p647_p11 }
  0x42   :  { %657 = shalt.err (!%p654_p1)
}
  0x43   :  { %90 = dma.hbm_to_vmem [thread:$0]  %s792_s6, 256, %s85_s30, [#allocation12], %s693_s15, %s693_s15, %s694_s16  }
  0x44   :  { %678 = dma.done.wait [#allocation3], 256  }
  0x45   :  { %679 = vsyncadd [#allocation3], 4294967040 }
  0x46   :  { %680 = dma.done.wait [#allocation6], 2176  }
  0x47   :  { %681 = vsyncadd [#allocation6], 4294965120 }
  0x48   :  { %682 = dma.done.wait [#allocation9], 768  }
  0x49   :  { %683 = vsyncadd [#allocation9], 4294966528 }
  0x4a   :  { %684 = dma.done.wait [#allocation12], 256  }
  0x4b   :  { %685 = vsyncadd [#allocation12], 4294967040  ;;  %v698_v0 = vmov 0.0   ;;  %vm699_vm0 = vmmov 0   ;;  %v514_v1 = vld [vmem:[#allocation5 + $0x78] sm:$0xff]   ;;  %v516_v3 = vld [vmem:[#allocation5 + $0x70] sm:$0xff]   ;;  %v382_v11 = vlaneseq }
  0x4c   :  { %489 = vmatprep.subr.bf16.mxu1 %v698_v0  ;;  %497 = vmatprep.mubr.msk.bf16.mxu1 %vm699_vm0, %v698_v0  ;;  %v515_v2 = vld [vmem:[#allocation5 + $0x38] sm:$0xff]   ;;  %v517_v4 = vld [vmem:[#allocation5 + $0x30] sm:$0xff]   ;;  %v518_v5 = vld [vmem:[#allocation5 + $0x68] sm:$0xff]   ;;  %vm330_vm1 = vcmask 523264  }
  0x4d   :  { %462 = vmatprep.subr.bf16.mxu0 %v514_v1  ;;  %v519_v6 = vld [vmem:[#allocation5 + $0x28] sm:$0xff]   ;;  %v520_v7 = vld [vmem:[#allocation5 + $0x60] sm:$0xff]   ;;  %v525_v10 = vld [vmem:[#allocation8 + $0x10] sm:$0xff]   ;;  %v383_v15 = vshrl.u32 %v382_v11, 7 }
  0x4e   :  { %463 = vmatpush3.bf16.msra.mxu0 %v515_v2  ;;  %v522_v8 = vld [vmem:[#allocation8 + $0x18] sm:$0xff]   ;;  %v523_v12 = vld [vmem:[#allocation5 + $0x58] sm:$0xff]   ;;  %v528_v13 = vld [vmem:[#allocation8 + $0x8] sm:$0xff]  }
  0x4f   :  { %464 = vmatprep.subr.bf16.mxu0 %v516_v3  ;;  %v521_v9 = vld [vmem:[#allocation5 + $0x20] sm:$0xff]   ;;  %490 = vmatpush3.bf16.msra.mxu1 %v522_v8  ;;  %v524_v14 = vld [vmem:[#allocation5 + $0x18] sm:$0xff]   ;;  %v526_v16 = vld [vmem:[#allocation5 + $0x50] sm:$0xff]   ;;  %v384_v19 = vsub.s32 0, %v383_v15  ;;  %v391_v22 = vsub.s32 1, %v383_v15 }
  0x50   :  { %491 = vmatprep.subr.bf16.mxu1 %v698_v0  ;;  %v531_v17 = vld [vmem:[#allocation8] sm:$0xff]   ;;  %v527_v18 = vld [vmem:[#allocation5 + $0x10] sm:$0xff]   ;;  %v534_v21 = vld [vmem:[#allocation7] sm:$0xff]  }
  0x51   :  { %v529_v20 = vld [vmem:[#allocation5 + $0x48] sm:$0xff]   ;;  %v537_v23 = vld [vmem:[#allocation2 + $0x4] ss:$8 sps:$4 sm:$0xff]   ;;  %v379_v24 = vld [vmem:[%s791_s5] sm:$0x3]  ;;  %s700_s5 = smov [#allocation13]  }
  0x52   :  { %465 = vmatpush3.bf16.msra.mxu0 %v517_v4  ;;  %v530_v25 = vld [vmem:[#allocation5 + $0x8] sm:$0xff]   ;;  %v385_v26 = vrot.slane %v379_v24, %v384_v19  ;;  %v532_v27 = vld [vmem:[#allocation5 + $0x40] sm:$0xff]   ;;  %282 = vmatprep.mubr.bf16.mxu0 %v537_v23  ;;  %v392_v28 = vrot.slane %v379_v24, %v391_v22  ;;  %v535_v30 = vld [vmem:[#allocation2] ss:$8 sps:$4 sm:$0xff]   ;;  %s423_s28 = sshll.u32 %s700_s5, 4  ;;  %s424_s28 = int_to_ptr.vmem [resolvable:$true] %s423_s28 }
  0x53   :  { %466 = vmatprep.subr.bf16.mxu0 %v518_v5  ;;  %492 = vmatpush3.bf16.msra.mxu1 %v525_v10  ;;  %v533_v29 = vld [vmem:[#allocation5] sm:$0xff]   ;;  %v376_v33 = vld [vmem:[#allocation10 + $0x8] sm:$0xff]  ;;  %v377_v47 = vld [vmem:[#allocation11] sm:$0xff]  ;;  %s658_s9 = scalar_lea.vmem %s424_s28, 512  ;;  %p663_p3 = scmp.lt.s32.totalorder %s424_s28, %s424_s28 }
  0x54   :  { %493 = vmatprep.subr.bf16.mxu1 %v698_v0  ;;  %406 = vbcast.lane.b32.xlu1 %v385_v26, 264  ;;  %v378_v32 = vld [vmem:[#allocation11 + $0x8] sm:$0xff]  ;;  %v375_v49 = vld [vmem:[#allocation10] sm:$0xff]  ;;  %p659_p2 = scmp.ne.s32.totalorder %s424_s28, %s658_s9  ;;  %p664_p4 = scmp.lt.s32.totalorder %s658_s9, %s658_s9 }
  0x55   :  { %387 = vbcast.lane.b32.xlu0 %v385_v26, 256 }
  0x56   :  { %467 = vmatpush3.bf16.msra.mxu0 %v519_v6  ;;  %p665_p5 = por %p664_p4, %p663_p3 }
  0x57   :  { %468 = vmatprep.subr.bf16.mxu0 %v520_v7  ;;  %494 = vmatpush3.bf16.msra.mxu1 %v528_v13 }
  0x58   :  { %495 = vmatprep.subr.bf16.mxu1 %v698_v0  ;;  %410 = vbcast.lane.b32.xlu1 %v392_v28, 264  ;;  %p666_p6 = pnand %p665_p5, %p659_p2 }
  0x59   :  { %394 = vbcast.lane.b32.xlu0 %v392_v28, 256 }
  0x5a   :  { %469 = vmatpush3.bf16.msra.mxu0 %v521_v9 }
  0x5b   :  { %470 = vmatprep.subr.bf16.mxu0 %v523_v12  ;;  %496 = vmatpush3.bf16.msra.mxu1 %v531_v17 }
  0x5e   :  { %471 = vmatpush3.bf16.msra.mxu0 %v524_v14  ;;  %498 = vmatmul.mubr.msk.bf16.vlgmr.msra.gmra.mxu1 %vm330_vm1, %v534_v21 }
  0x5f   :  { %472 = vmatprep.subr.bf16.mxu0 %v526_v16 }
  0x62   :  { %473 = vmatpush3.bf16.msra.mxu0 %v527_v18 }
  0x63   :  { %474 = vmatprep.subr.bf16.mxu0 %v529_v20 }
  0x66   :  { %475 = vmatpush3.bf16.msra.mxu0 %v530_v25 }
  0x67   :  { %476 = vmatprep.subr.bf16.mxu0 %v532_v27 }
  0x6a   :  { %477 = vmatpush3.bf16.msra.mxu0 %v533_v29 }
  0x6d   :  { %283 = vmatmul.mubr.bf16.vlgmr.msra.gmra.mxu0 %v535_v30 }
  0xc6   :  { %v407_v31 = vpop.permute.xlu1 %406 }
  0xc7   :  { %v412_v34 = vmul.f32 %v407_v31, %v378_v32  ;;  %v388_v45 = vpop.permute.xlu0 %387 }
  0xc8   :  { %v396_v51 = vmul.f32 %v388_v45, %v377_v47 }
  0xca   :  { %v411_v36 = vpop.permute.xlu1 %410 }
  0xcb   :  { %v413_v40 = vmul.f32 %v411_v36, %v378_v32  ;;  %v395_v53 = vpop.permute.xlu0 %394 }
  0xcc   :  { %v397_v58 = vmul.f32 %v395_v53, %v377_v47 }
 0x11e   :  { %v368_v35 = vpop.f32.mrf.mxu1 }
 0x11f   :  { %v402_v37 = vmul.f32 %v376_v33, %v368_v35 }
 0x120   :  { %v499_v38 = vpop.f32.mrf.mxu1 }
 0x121   :  { %v414_v39 = vadd.f32 %v412_v34, %v402_v37 }
 0x122   :  { %v371_v41 = vpop.f32.mrf.mxu1 }
 0x123   :  { %416 = vst [vmem:[#allocation13 + $0x8] sm:$0xff] %v414_v39  ;;  %v403_v42 = vmul.f32 %v376_v33, %v371_v41 }
 0x124   :  { %v500_v43 = vpop.f32.mrf.mxu1 }
 0x125   :  { %v415_v44 = vadd.f32 %v413_v40, %v403_v42 }
 0x127   :  { %417 = vst [vmem:[#allocation13 + $0x18] sm:$0xff] %v415_v44 }
 0x12d   :  { %v478_v46 = vpop.f32.mrf.mxu0 }
 0x12f   :  { %v479_v48 = vpop.f32.mrf.mxu0 }
 0x130   :  { %v480_v50 = vadd.f32 %v479_v48, %v478_v46 }
 0x131   :  { %v481_v52 = vpop.f32.mrf.mxu0 }
 0x132   :  { %v380_v54 = vmul.f32 %v480_v50, %v375_v49 }
 0x133   :  { %v482_v55 = vpop.f32.mrf.mxu0 }
 0x134   :  { %v398_v56 = vadd.f32 %v396_v51, %v380_v54  ;;  %v483_v57 = vadd.f32 %v482_v55, %v481_v52 }
 0x136   :  { %400 = vst [vmem:[#allocation13] sm:$0xff] %v398_v56  ;;  %v381_v59 = vmul.f32 %v483_v57, %v375_v49 }
 0x138   :  { %v399_v60 = vadd.f32 %v397_v58, %v381_v59 }
 0x13a   :  { %401 = vst [vmem:[#allocation13 + $0x10] sm:$0xff] %v399_v60 }
 0x13b   :  { %669 = shalt.err (!%p666_p6)
}
 0x13c   :  { %429 = dma.vmem_to_hbm [thread:$0]  %s424_s28, 512, %s793_s7, [#allocation4], %s693_s15, %s693_s15, %s694_s16  }
 0x13d   :  { %686 = dma.done.wait [#allocation4], 512  }
 0x13e   :  { %687 = vsyncadd [#allocation4], 4294966784 }
 0x13f   :  { %433 = vsyncpa [#allocation3], 1 }
 0x140   :  { %434 = vsyncpa [#allocation6], 1 }
 0x141   :  { %435 = vsyncpa [#allocation9], 1 }
 0x142   :  { %436 = vsyncpa [#allocation12], 1 }
 0x143   :  { %437 = vsyncpa [#allocation4], 1 }

</bundles_post_ra>
